<compile_context>
chip_gen: v7x
topology: tpu7x:2x2x1
jax: 0.10.0
libtpu: 0.0.40
codegen_flags: <defaults>
</compile_context>

<pallas_src>
import jax
import jax.numpy as jnp
from jax.experimental import pallas as pl
from jax.experimental.pallas import tpu as pltpu


# ---------------------------------------------------------------------------
# Lanczos lgamma (g = 7, 9 coefficients), valid for z > 0, rewritten as a
# rational so the series costs VPU multiplies/adds plus only two logs.
# ---------------------------------------------------------------------------
_LANCZOS_G = 7.0
_LANCZOS_COEF = (
    0.99999999999980993,
    676.5203681218851,
    -1259.1392167224028,
    771.32342877765313,
    -176.61502916214059,
    12.507343278686905,
    -0.13857109526572012,
    9.9843695780195716e-6,
    1.5056327351493116e-7,
)
_HALF_LOG_2PI = 0.9189385332046727  # 0.5 * log(2*pi)


def _lgamma_pos(z):
    """lgamma(z) for z > 0. Lanczos series as one rational P(w)/Q(w).

    series(w) = c0 + sum_k c_{k+1} / (w + k + 1)
              = P(w) / Q(w),   Q(w) = prod_k (w + k + 1)
    P is built from prefix/suffix partial products (all VPU work); only
    log(P) and log(Q) touch the EUP (vs. 8 divides + 1 log before).
    """
    w = z - 1.0
    d = [w + float(k + 1) for k in range(8)]           # d[k] = w + k + 1 > 0

    # prefix[i] = d[0]*...*d[i-1]  (i = 1..8);  prefix[8] == Q
    prefix = [None] * 9
    prefix[1] = d[0]
    for i in range(2, 9):
        prefix[i] = prefix[i - 1] * d[i - 1]
    # suffix[i] = d[i+1]*...*d[7]  (i = 0..6)
    suffix = [None] * 8
    suffix[6] = d[7]
    for i in range(5, -1, -1):
        suffix[i] = suffix[i + 1] * d[i + 1]

    q = prefix[8]
    # P(w) = c0*Q + sum_k c_{k+1} * prod_{j != k} d[j]
    p = _LANCZOS_COEF[0] * q
    p = p + _LANCZOS_COEF[1] * suffix[0]               # k = 0
    for k in range(1, 7):
        p = p + _LANCZOS_COEF[k + 1] * (prefix[k] * suffix[k])
    p = p + _LANCZOS_COEF[8] * prefix[7]               # k = 7

    t = w + _LANCZOS_G + 0.5
    return _HALF_LOG_2PI + (w + 0.5) * jnp.log(t) - t + (jnp.log(p) - jnp.log(q))


# ---------------------------------------------------------------------------
# Pallas kernel: elementwise Beta pdf on one (block_rows, 128) tile.
# ---------------------------------------------------------------------------
def _beta_pdf_kernel(x_ref, alpha_ref, beta_ref, out_ref):
    x = x_ref[...]
    a = alpha_ref[...]
    b = beta_ref[...]

    # log B(a, b) = lgamma(a) + lgamma(b) - lgamma(a + b)
    log_beta_ab = _lgamma_pos(a) + _lgamma_pos(b) - _lgamma_pos(a + b)

    am1 = a - 1.0
    bm1 = b - 1.0
    # xlogy-style guards: when the exponent is 0, the power term is exactly 1
    # (matches torch.pow even at x == 0 or x == 1).
    t1 = jnp.where(am1 == 0.0, 0.0, am1 * jnp.log(x))
    t2 = jnp.where(bm1 == 0.0, 0.0, bm1 * jnp.log1p(-x))

    out_ref[...] = jnp.exp(t1 + t2 - log_beta_ab)


def _round_up(n, m):
    return ((n + m - 1) // m) * m


def beta_pdf(x, alpha, beta, *, block_rows=1024):
    """Elementwise Beta pdf. x, alpha, beta: same-shape arrays (any size)."""
    assert x.shape == alpha.shape == beta.shape
    orig_shape = x.shape

    lanes = 128
    total = int(x.size)
    rows = max(1, -(-total // lanes))                  # ceil(total / 128)

    # Pick a block size: big tiles for throughput, but keep >= 2 grid steps
    # (so v7x's two TensorCores are both used) whenever the input allows it.
    n_blocks = max(1, -(-rows // block_rows))
    if n_blocks == 1 and rows >= 16:
        n_blocks = 2
    eff_block = _round_up(max(1, -(-rows // n_blocks)), 8)
    rows_padded = n_blocks * eff_block
    padded_total = rows_padded * lanes

    def _flat_pad(a, fill):
        a = jnp.ravel(a).astype(jnp.float32)
        pad = padded_total - total
        if pad:
            a = jnp.concatenate([a, jnp.full((pad,), fill, jnp.float32)])
        return a.reshape(rows_padded, lanes)

    # Benign padding values (x=0.5, alpha=beta=2) keep the pad region finite.
    x2 = _flat_pad(x, 0.5)
    a2 = _flat_pad(alpha, 2.0)
    b2 = _flat_pad(beta, 2.0)

    grid = (n_blocks,)
    spec = pl.BlockSpec((eff_block, lanes), lambda i: (i, 0))

    n_elems = padded_total
    cost = pl.CostEstimate(
        flops=150 * n_elems,            # ~45 VPU ops per lgamma * 3 + pdf tail
        transcendentals=12 * n_elems,   # 9 logs (3 lgammas) + log, log1p, exp
        bytes_accessed=16 * n_elems,    # 3 f32 inputs + 1 f32 output
    )

    out = pl.pallas_call(
        _beta_pdf_kernel,
        out_shape=jax.ShapeDtypeStruct((rows_padded, lanes), jnp.float32),
        grid_spec=pltpu.PrefetchScalarGridSpec(
            num_scalar_prefetch=0,
            grid=grid,
            in_specs=[spec, spec, spec],
            out_specs=spec,
        ),
        compiler_params=pltpu.CompilerParams(
            dimension_semantics=("parallel",),
        ),
        cost_estimate=cost,
    )(x2, a2, b2)

    return out.reshape(-1)[:total].reshape(orig_shape)


# Plain-JAX reference (same formula as the PyTorch module, via lax.lgamma).
def _beta_pdf_ref(x, alpha, beta):
    lg = jax.lax.lgamma
    beta_ab = jnp.exp(lg(alpha) + lg(beta) - lg(alpha + beta))
    return jnp.power(x, alpha - 1.0) * jnp.power(1.0 - x, beta - 1.0) / beta_ab


if __name__ == "__main__":
    key = jax.random.PRNGKey(0)

    ok = True
    # Two small shapes: a tile-aligned one and a ragged one (exercises the
    # pad/slice path of the wrapper).
    for shape in [(8, 128), (4, 200)]:
        kx, ka, kb, key = jax.random.split(key, 4)
        x = jax.random.uniform(kx, shape, jnp.float32, minval=0.05, maxval=0.95)
        alpha = jax.random.uniform(ka, shape, jnp.float32, minval=0.6, maxval=5.0)
        beta = jax.random.uniform(kb, shape, jnp.float32, minval=0.6, maxval=5.0)

        p = jax.block_until_ready(beta_pdf(x, alpha, beta))
        p_ref = _beta_pdf_ref(x, alpha, beta)

        assert p.shape == shape and p.dtype == jnp.float32
        ok &= bool(jnp.allclose(p, p_ref, rtol=1e-3, atol=1e-5))

    assert ok, "mismatch vs reference"
    print("KERNEL_OK")
</pallas_src>

<mosaic_0001>
module attributes {stable_mosaic.version = 11 : i64} {
  func.func @_beta_pdf_kernel(%arg0: i32, %arg1: memref<8x128xf32, #tpu.memory_space<vmem>>, %arg2: memref<8x128xf32, #tpu.memory_space<vmem>>, %arg3: memref<8x128xf32, #tpu.memory_space<vmem>>, %arg4: memref<8x128xf32, #tpu.memory_space<vmem>>) attributes {dimension_semantics = [#tpu.dimension_semantics<parallel>], iteration_bounds = array<i64: 1>, scalar_prefetch = 0 : i64, scratch_operands = 0 : i64, tpu.core_type = #tpu.core_type<tc>, window_params = [{transform_indices = @transform_0, window_bounds = array<i64: 8, 128>}, {transform_indices = @transform_1, window_bounds = array<i64: 8, 128>}, {transform_indices = @transform_2, window_bounds = array<i64: 8, 128>}, {transform_indices = @transform_3, window_bounds = array<i64: 8, 128>}]} {
    %c0 = arith.constant 0 : index
    %c0_0 = arith.constant 0 : index
    %0 = vector.load %arg1[%c0, %c0_0] : memref<8x128xf32, #tpu.memory_space<vmem>>, vector<8x128xf32>
    %c0_1 = arith.constant 0 : index
    %c0_2 = arith.constant 0 : index
    %1 = vector.load %arg2[%c0_1, %c0_2] : memref<8x128xf32, #tpu.memory_space<vmem>>, vector<8x128xf32>
    %c0_3 = arith.constant 0 : index
    %c0_4 = arith.constant 0 : index
    %2 = vector.load %arg3[%c0_3, %c0_4] : memref<8x128xf32, #tpu.memory_space<vmem>>, vector<8x128xf32>
    %cst = arith.constant 1.000000e+00 : f32
    %3 = vector.broadcast %cst : f32 to vector<8x128xf32>
    %4 = arith.subf %1, %3 : vector<8x128xf32>
    %cst_5 = arith.constant 1.000000e+00 : f32
    %5 = vector.broadcast %cst_5 : f32 to vector<8x128xf32>
    %6 = arith.addf %4, %5 : vector<8x128xf32>
    %cst_6 = arith.constant 2.000000e+00 : f32
    %7 = vector.broadcast %cst_6 : f32 to vector<8x128xf32>
    %8 = arith.addf %4, %7 : vector<8x128xf32>
    %cst_7 = arith.constant 3.000000e+00 : f32
    %9 = vector.broadcast %cst_7 : f32 to vector<8x128xf32>
    %10 = arith.addf %4, %9 : vector<8x128xf32>
    %cst_8 = arith.constant 4.000000e+00 : f32
    %11 = vector.broadcast %cst_8 : f32 to vector<8x128xf32>
    %12 = arith.addf %4, %11 : vector<8x128xf32>
    %cst_9 = arith.constant 5.000000e+00 : f32
    %13 = vector.broadcast %cst_9 : f32 to vector<8x128xf32>
    %14 = arith.addf %4, %13 : vector<8x128xf32>
    %cst_10 = arith.constant 6.000000e+00 : f32
    %15 = vector.broadcast %cst_10 : f32 to vector<8x128xf32>
    %16 = arith.addf %4, %15 : vector<8x128xf32>
    %cst_11 = arith.constant 7.000000e+00 : f32
    %17 = vector.broadcast %cst_11 : f32 to vector<8x128xf32>
    %18 = arith.addf %4, %17 : vector<8x128xf32>
    %cst_12 = arith.constant 8.000000e+00 : f32
    %19 = vector.broadcast %cst_12 : f32 to vector<8x128xf32>
    %20 = arith.addf %4, %19 : vector<8x128xf32>
    %21 = arith.mulf %6, %8 : vector<8x128xf32>
    %22 = arith.mulf %21, %10 : vector<8x128xf32>
    %23 = arith.mulf %22, %12 : vector<8x128xf32>
    %24 = arith.mulf %23, %14 : vector<8x128xf32>
    %25 = arith.mulf %24, %16 : vector<8x128xf32>
    %26 = arith.mulf %25, %18 : vector<8x128xf32>
    %27 = arith.mulf %26, %20 : vector<8x128xf32>
    %28 = arith.mulf %20, %18 : vector<8x128xf32>
    %29 = arith.mulf %28, %16 : vector<8x128xf32>
    %30 = arith.mulf %29, %14 : vector<8x128xf32>
    %31 = arith.mulf %30, %12 : vector<8x128xf32>
    %32 = arith.mulf %31, %10 : vector<8x128xf32>
    %33 = arith.mulf %32, %8 : vector<8x128xf32>
    %cst_13 = arith.constant 1.000000e+00 : f32
    %34 = vector.broadcast %cst_13 : f32 to vector<8x128xf32>
    %35 = arith.mulf %34, %27 : vector<8x128xf32>
    %cst_14 = arith.constant 676.520386 : f32
    %36 = vector.broadcast %cst_14 : f32 to vector<8x128xf32>
    %37 = arith.mulf %36, %33 : vector<8x128xf32>
    %38 = arith.addf %35, %37 : vector<8x128xf32>
    %39 = arith.mulf %6, %32 : vector<8x128xf32>
    %cst_15 = arith.constant -1259.13916 : f32
    %40 = vector.broadcast %cst_15 : f32 to vector<8x128xf32>
    %41 = arith.mulf %40, %39 : vector<8x128xf32>
    %42 = arith.addf %38, %41 : vector<8x128xf32>
    %43 = arith.mulf %21, %31 : vector<8x128xf32>
    %cst_16 = arith.constant 771.323425 : f32
    %44 = vector.broadcast %cst_16 : f32 to vector<8x128xf32>
    %45 = arith.mulf %44, %43 : vector<8x128xf32>
    %46 = arith.addf %42, %45 : vector<8x128xf32>
    %47 = arith.mulf %22, %30 : vector<8x128xf32>
    %cst_17 = arith.constant -176.615036 : f32
    %48 = vector.broadcast %cst_17 : f32 to vector<8x128xf32>
    %49 = arith.mulf %48, %47 : vector<8x128xf32>
    %50 = arith.addf %46, %49 : vector<8x128xf32>
    %51 = arith.mulf %23, %29 : vector<8x128xf32>
    %cst_18 = arith.constant 12.5073433 : f32
    %52 = vector.broadcast %cst_18 : f32 to vector<8x128xf32>
    %53 = arith.mulf %52, %51 : vector<8x128xf32>
    %54 = arith.addf %50, %53 : vector<8x128xf32>
    %55 = arith.mulf %24, %28 : vector<8x128xf32>
    %cst_19 = arith.constant -0.138571098 : f32
    %56 = vector.broadcast %cst_19 : f32 to vector<8x128xf32>
    %57 = arith.mulf %56, %55 : vector<8x128xf32>
    %58 = arith.addf %54, %57 : vector<8x128xf32>
    %59 = arith.mulf %25, %20 : vector<8x128xf32>
    %cst_20 = arith.constant 9.98436917E-6 : f32
    %60 = vector.broadcast %cst_20 : f32 to vector<8x128xf32>
    %61 = arith.mulf %60, %59 : vector<8x128xf32>
    %62 = arith.addf %58, %61 : vector<8x128xf32>
    %cst_21 = arith.constant 1.50563267E-7 : f32
    %63 = vector.broadcast %cst_21 : f32 to vector<8x128xf32>
    %64 = arith.mulf %63, %26 : vector<8x128xf32>
    %65 = arith.addf %62, %64 : vector<8x128xf32>
    %cst_22 = arith.constant 7.000000e+00 : f32
    %66 = vector.broadcast %cst_22 : f32 to vector<8x128xf32>
    %67 = arith.addf %4, %66 : vector<8x128xf32>
    %cst_23 = arith.constant 5.000000e-01 : f32
    %68 = vector.broadcast %cst_23 : f32 to vector<8x128xf32>
    %69 = arith.addf %67, %68 : vector<8x128xf32>
    %cst_24 = arith.constant 5.000000e-01 : f32
    %70 = vector.broadcast %cst_24 : f32 to vector<8x128xf32>
    %71 = arith.addf %4, %70 : vector<8x128xf32>
    %72 = math.log %69 : vector<8x128xf32>
    %73 = arith.mulf %71, %72 : vector<8x128xf32>
    %cst_25 = arith.constant 0.918938517 : f32
    %74 = vector.broadcast %cst_25 : f32 to vector<8x128xf32>
    %75 = arith.addf %74, %73 : vector<8x128xf32>
    %76 = arith.subf %75, %69 : vector<8x128xf32>
    %77 = math.log %65 : vector<8x128xf32>
    %78 = math.log %27 : vector<8x128xf32>
    %79 = arith.subf %77, %78 : vector<8x128xf32>
    %80 = arith.addf %76, %79 : vector<8x128xf32>
    %cst_26 = arith.constant 1.000000e+00 : f32
    %81 = vector.broadcast %cst_26 : f32 to vector<8x128xf32>
    %82 = arith.subf %2, %81 : vector<8x128xf32>
    %cst_27 = arith.constant 1.000000e+00 : f32
    %83 = vector.broadcast %cst_27 : f32 to vector<8x128xf32>
    %84 = arith.addf %82, %83 : vector<8x128xf32>
    %cst_28 = arith.constant 2.000000e+00 : f32
    %85 = vector.broadcast %cst_28 : f32 to vector<8x128xf32>
    %86 = arith.addf %82, %85 : vector<8x128xf32>
    %cst_29 = arith.constant 3.000000e+00 : f32
    %87 = vector.broadcast %cst_29 : f32 to vector<8x128xf32>
    %88 = arith.addf %82, %87 : vector<8x128xf32>
    %cst_30 = arith.constant 4.000000e+00 : f32
    %89 = vector.broadcast %cst_30 : f32 to vector<8x128xf32>
    %90 = arith.addf %82, %89 : vector<8x128xf32>
    %cst_31 = arith.constant 5.000000e+00 : f32
    %91 = vector.broadcast %cst_31 : f32 to vector<8x128xf32>
    %92 = arith.addf %82, %91 : vector<8x128xf32>
    %cst_32 = arith.constant 6.000000e+00 : f32
    %93 = vector.broadcast %cst_32 : f32 to vector<8x128xf32>
    %94 = arith.addf %82, %93 : vector<8x128xf32>
    %cst_33 = arith.constant 7.000000e+00 : f32
    %95 = vector.broadcast %cst_33 : f32 to vector<8x128xf32>
    %96 = arith.addf %82, %95 : vector<8x128xf32>
    %cst_34 = arith.constant 8.000000e+00 : f32
    %97 = vector.broadcast %cst_34 : f32 to vector<8x128xf32>
    %98 = arith.addf %82, %97 : vector<8x128xf32>
    %99 = arith.mulf %84, %86 : vector<8x128xf32>
    %100 = arith.mulf %99, %88 : vector<8x128xf32>
    %101 = arith.mulf %100, %90 : vector<8x128xf32>
    %102 = arith.mulf %101, %92 : vector<8x128xf32>
    %103 = arith.mulf %102, %94 : vector<8x128xf32>
    %104 = arith.mulf %103, %96 : vector<8x128xf32>
    %105 = arith.mulf %104, %98 : vector<8x128xf32>
    %106 = arith.mulf %98, %96 : vector<8x128xf32>
    %107 = arith.mulf %106, %94 : vector<8x128xf32>
    %108 = arith.mulf %107, %92 : vector<8x128xf32>
    %109 = arith.mulf %108, %90 : vector<8x128xf32>
    %110 = arith.mulf %109, %88 : vector<8x128xf32>
    %111 = arith.mulf %110, %86 : vector<8x128xf32>
    %cst_35 = arith.constant 1.000000e+00 : f32
    %112 = vector.broadcast %cst_35 : f32 to vector<8x128xf32>
    %113 = arith.mulf %112, %105 : vector<8x128xf32>
    %cst_36 = arith.constant 676.520386 : f32
    %114 = vector.broadcast %cst_36 : f32 to vector<8x128xf32>
    %115 = arith.mulf %114, %111 : vector<8x128xf32>
    %116 = arith.addf %113, %115 : vector<8x128xf32>
    %117 = arith.mulf %84, %110 : vector<8x128xf32>
    %cst_37 = arith.constant -1259.13916 : f32
    %118 = vector.broadcast %cst_37 : f32 to vector<8x128xf32>
    %119 = arith.mulf %118, %117 : vector<8x128xf32>
    %120 = arith.addf %116, %119 : vector<8x128xf32>
    %121 = arith.mulf %99, %109 : vector<8x128xf32>
    %cst_38 = arith.constant 771.323425 : f32
    %122 = vector.broadcast %cst_38 : f32 to vector<8x128xf32>
    %123 = arith.mulf %122, %121 : vector<8x128xf32>
    %124 = arith.addf %120, %123 : vector<8x128xf32>
    %125 = arith.mulf %100, %108 : vector<8x128xf32>
    %cst_39 = arith.constant -176.615036 : f32
    %126 = vector.broadcast %cst_39 : f32 to vector<8x128xf32>
    %127 = arith.mulf %126, %125 : vector<8x128xf32>
    %128 = arith.addf %124, %127 : vector<8x128xf32>
    %129 = arith.mulf %101, %107 : vector<8x128xf32>
    %cst_40 = arith.constant 12.5073433 : f32
    %130 = vector.broadcast %cst_40 : f32 to vector<8x128xf32>
    %131 = arith.mulf %130, %129 : vector<8x128xf32>
    %132 = arith.addf %128, %131 : vector<8x128xf32>
    %133 = arith.mulf %102, %106 : vector<8x128xf32>
    %cst_41 = arith.constant -0.138571098 : f32
    %134 = vector.broadcast %cst_41 : f32 to vector<8x128xf32>
    %135 = arith.mulf %134, %133 : vector<8x128xf32>
    %136 = arith.addf %132, %135 : vector<8x128xf32>
    %137 = arith.mulf %103, %98 : vector<8x128xf32>
    %cst_42 = arith.constant 9.98436917E-6 : f32
    %138 = vector.broadcast %cst_42 : f32 to vector<8x128xf32>
    %139 = arith.mulf %138, %137 : vector<8x128xf32>
    %140 = arith.addf %136, %139 : vector<8x128xf32>
    %cst_43 = arith.constant 1.50563267E-7 : f32
    %141 = vector.broadcast %cst_43 : f32 to vector<8x128xf32>
    %142 = arith.mulf %141, %104 : vector<8x128xf32>
    %143 = arith.addf %140, %142 : vector<8x128xf32>
    %cst_44 = arith.constant 7.000000e+00 : f32
    %144 = vector.broadcast %cst_44 : f32 to vector<8x128xf32>
    %145 = arith.addf %82, %144 : vector<8x128xf32>
    %cst_45 = arith.constant 5.000000e-01 : f32
    %146 = vector.broadcast %cst_45 : f32 to vector<8x128xf32>
    %147 = arith.addf %145, %146 : vector<8x128xf32>
    %cst_46 = arith.constant 5.000000e-01 : f32
    %148 = vector.broadcast %cst_46 : f32 to vector<8x128xf32>
    %149 = arith.addf %82, %148 : vector<8x128xf32>
    %150 = math.log %147 : vector<8x128xf32>
    %151 = arith.mulf %149, %150 : vector<8x128xf32>
    %cst_47 = arith.constant 0.918938517 : f32
    %152 = vector.broadcast %cst_47 : f32 to vector<8x128xf32>
    %153 = arith.addf %152, %151 : vector<8x128xf32>
    %154 = arith.subf %153, %147 : vector<8x128xf32>
    %155 = math.log %143 : vector<8x128xf32>
    %156 = math.log %105 : vector<8x128xf32>
    %157 = arith.subf %155, %156 : vector<8x128xf32>
    %158 = arith.addf %154, %157 : vector<8x128xf32>
    %159 = arith.addf %80, %158 : vector<8x128xf32>
    %160 = arith.addf %1, %2 : vector<8x128xf32>
    %cst_48 = arith.constant 1.000000e+00 : f32
    %161 = vector.broadcast %cst_48 : f32 to vector<8x128xf32>
    %162 = arith.subf %160, %161 : vector<8x128xf32>
    %cst_49 = arith.constant 1.000000e+00 : f32
    %163 = vector.broadcast %cst_49 : f32 to vector<8x128xf32>
    %164 = arith.addf %162, %163 : vector<8x128xf32>
    %cst_50 = arith.constant 2.000000e+00 : f32
    %165 = vector.broadcast %cst_50 : f32 to vector<8x128xf32>
    %166 = arith.addf %162, %165 : vector<8x128xf32>
    %cst_51 = arith.constant 3.000000e+00 : f32
    %167 = vector.broadcast %cst_51 : f32 to vector<8x128xf32>
    %168 = arith.addf %162, %167 : vector<8x128xf32>
    %cst_52 = arith.constant 4.000000e+00 : f32
    %169 = vector.broadcast %cst_52 : f32 to vector<8x128xf32>
    %170 = arith.addf %162, %169 : vector<8x128xf32>
    %cst_53 = arith.constant 5.000000e+00 : f32
    %171 = vector.broadcast %cst_53 : f32 to vector<8x128xf32>
    %172 = arith.addf %162, %171 : vector<8x128xf32>
    %cst_54 = arith.constant 6.000000e+00 : f32
    %173 = vector.broadcast %cst_54 : f32 to vector<8x128xf32>
    %174 = arith.addf %162, %173 : vector<8x128xf32>
    %cst_55 = arith.constant 7.000000e+00 : f32
    %175 = vector.broadcast %cst_55 : f32 to vector<8x128xf32>
    %176 = arith.addf %162, %175 : vector<8x128xf32>
    %cst_56 = arith.constant 8.000000e+00 : f32
    %177 = vector.broadcast %cst_56 : f32 to vector<8x128xf32>
    %178 = arith.addf %162, %177 : vector<8x128xf32>
    %179 = arith.mulf %164, %166 : vector<8x128xf32>
    %180 = arith.mulf %179, %168 : vector<8x128xf32>
    %181 = arith.mulf %180, %170 : vector<8x128xf32>
    %182 = arith.mulf %181, %172 : vector<8x128xf32>
    %183 = arith.mulf %182, %174 : vector<8x128xf32>
    %184 = arith.mulf %183, %176 : vector<8x128xf32>
    %185 = arith.mulf %184, %178 : vector<8x128xf32>
    %186 = arith.mulf %178, %176 : vector<8x128xf32>
    %187 = arith.mulf %186, %174 : vector<8x128xf32>
    %188 = arith.mulf %187, %172 : vector<8x128xf32>
    %189 = arith.mulf %188, %170 : vector<8x128xf32>
    %190 = arith.mulf %189, %168 : vector<8x128xf32>
    %191 = arith.mulf %190, %166 : vector<8x128xf32>
    %cst_57 = arith.constant 1.000000e+00 : f32
    %192 = vector.broadcast %cst_57 : f32 to vector<8x128xf32>
    %193 = arith.mulf %192, %185 : vector<8x128xf32>
    %cst_58 = arith.constant 676.520386 : f32
    %194 = vector.broadcast %cst_58 : f32 to vector<8x128xf32>
    %195 = arith.mulf %194, %191 : vector<8x128xf32>
    %196 = arith.addf %193, %195 : vector<8x128xf32>
    %197 = arith.mulf %164, %190 : vector<8x128xf32>
    %cst_59 = arith.constant -1259.13916 : f32
    %198 = vector.broadcast %cst_59 : f32 to vector<8x128xf32>
    %199 = arith.mulf %198, %197 : vector<8x128xf32>
    %200 = arith.addf %196, %199 : vector<8x128xf32>
    %201 = arith.mulf %179, %189 : vector<8x128xf32>
    %cst_60 = arith.constant 771.323425 : f32
    %202 = vector.broadcast %cst_60 : f32 to vector<8x128xf32>
    %203 = arith.mulf %202, %201 : vector<8x128xf32>
    %204 = arith.addf %200, %203 : vector<8x128xf32>
    %205 = arith.mulf %180, %188 : vector<8x128xf32>
    %cst_61 = arith.constant -176.615036 : f32
    %206 = vector.broadcast %cst_61 : f32 to vector<8x128xf32>
    %207 = arith.mulf %206, %205 : vector<8x128xf32>
    %208 = arith.addf %204, %207 : vector<8x128xf32>
    %209 = arith.mulf %181, %187 : vector<8x128xf32>
    %cst_62 = arith.constant 12.5073433 : f32
    %210 = vector.broadcast %cst_62 : f32 to vector<8x128xf32>
    %211 = arith.mulf %210, %209 : vector<8x128xf32>
    %212 = arith.addf %208, %211 : vector<8x128xf32>
    %213 = arith.mulf %182, %186 : vector<8x128xf32>
    %cst_63 = arith.constant -0.138571098 : f32
    %214 = vector.broadcast %cst_63 : f32 to vector<8x128xf32>
    %215 = arith.mulf %214, %213 : vector<8x128xf32>
    %216 = arith.addf %212, %215 : vector<8x128xf32>
    %217 = arith.mulf %183, %178 : vector<8x128xf32>
    %cst_64 = arith.constant 9.98436917E-6 : f32
    %218 = vector.broadcast %cst_64 : f32 to vector<8x128xf32>
    %219 = arith.mulf %218, %217 : vector<8x128xf32>
    %220 = arith.addf %216, %219 : vector<8x128xf32>
    %cst_65 = arith.constant 1.50563267E-7 : f32
    %221 = vector.broadcast %cst_65 : f32 to vector<8x128xf32>
    %222 = arith.mulf %221, %184 : vector<8x128xf32>
    %223 = arith.addf %220, %222 : vector<8x128xf32>
    %cst_66 = arith.constant 7.000000e+00 : f32
    %224 = vector.broadcast %cst_66 : f32 to vector<8x128xf32>
    %225 = arith.addf %162, %224 : vector<8x128xf32>
    %cst_67 = arith.constant 5.000000e-01 : f32
    %226 = vector.broadcast %cst_67 : f32 to vector<8x128xf32>
    %227 = arith.addf %225, %226 : vector<8x128xf32>
    %cst_68 = arith.constant 5.000000e-01 : f32
    %228 = vector.broadcast %cst_68 : f32 to vector<8x128xf32>
    %229 = arith.addf %162, %228 : vector<8x128xf32>
    %230 = math.log %227 : vector<8x128xf32>
    %231 = arith.mulf %229, %230 : vector<8x128xf32>
    %cst_69 = arith.constant 0.918938517 : f32
    %232 = vector.broadcast %cst_69 : f32 to vector<8x128xf32>
    %233 = arith.addf %232, %231 : vector<8x128xf32>
    %234 = arith.subf %233, %227 : vector<8x128xf32>
    %235 = math.log %223 : vector<8x128xf32>
    %236 = math.log %185 : vector<8x128xf32>
    %237 = arith.subf %235, %236 : vector<8x128xf32>
    %238 = arith.addf %234, %237 : vector<8x128xf32>
    %239 = arith.subf %159, %238 : vector<8x128xf32>
    %cst_70 = arith.constant 1.000000e+00 : f32
    %240 = vector.broadcast %cst_70 : f32 to vector<8x128xf32>
    %241 = arith.subf %1, %240 : vector<8x128xf32>
    %cst_71 = arith.constant 1.000000e+00 : f32
    %242 = vector.broadcast %cst_71 : f32 to vector<8x128xf32>
    %243 = arith.subf %2, %242 : vector<8x128xf32>
    %cst_72 = arith.constant 0.000000e+00 : f32
    %244 = vector.broadcast %cst_72 : f32 to vector<8x128xf32>
    %245 = arith.cmpf oeq, %241, %244 : vector<8x128xf32>
    %246 = math.log %0 : vector<8x128xf32>
    %247 = arith.mulf %241, %246 : vector<8x128xf32>
    %cst_73 = arith.constant 0.000000e+00 : f32
    %248 = vector.broadcast %cst_73 : f32 to vector<8x128xf32>
    %249 = arith.select %245, %248, %247 : vector<8x128xi1>, vector<8x128xf32>
    %cst_74 = arith.constant 0.000000e+00 : f32
    %250 = vector.broadcast %cst_74 : f32 to vector<8x128xf32>
    %251 = arith.cmpf oeq, %243, %250 : vector<8x128xf32>
    %cst_75 = arith.constant 0.000000e+00 : f32
    %252 = vector.broadcast %cst_75 : f32 to vector<8x128xf32>
    %253 = arith.subf %252, %0 : vector<8x128xf32>
    %254 = math.log1p %253 : vector<8x128xf32>
    %255 = arith.mulf %243, %254 : vector<8x128xf32>
    %cst_76 = arith.constant 0.000000e+00 : f32
    %256 = vector.broadcast %cst_76 : f32 to vector<8x128xf32>
    %257 = arith.select %251, %256, %255 : vector<8x128xi1>, vector<8x128xf32>
    %258 = arith.addf %249, %257 : vector<8x128xf32>
    %259 = arith.subf %258, %239 : vector<8x128xf32>
    %260 = math.exp %259 : vector<8x128xf32>
    %c0_77 = arith.constant 0 : index
    %c0_78 = arith.constant 0 : index
    %261 = vector.load %arg4[%c0_77, %c0_78] : memref<8x128xf32, #tpu.memory_space<vmem>>, vector<8x128xf32>
    tpu.vector_store %arg4[%c0_77, %c0_78], %260 {strides = array<i32>} : memref<8x128xf32, #tpu.memory_space<vmem>>, vector<8x128xf32>,
    return
  }
  func.func @transform_0(%arg0: i32) -> (i32, i32) {
    %c0_i32 = arith.constant 0 : i32
    %c0_i32_0 = arith.constant 0 : i32
    return %arg0, %c0_i32 : i32, i32
  }
  func.func @transform_1(%arg0: i32) -> (i32, i32) {
    %c0_i32 = arith.constant 0 : i32
    %c0_i32_0 = arith.constant 0 : i32
    return %arg0, %c0_i32 : i32, i32
  }
  func.func @transform_2(%arg0: i32) -> (i32, i32) {
    %c0_i32 = arith.constant 0 : i32
    %c0_i32_0 = arith.constant 0 : i32
    return %arg0, %c0_i32 : i32, i32
  }
  func.func @transform_3(%arg0: i32) -> (i32, i32) {
    %c0_i32 = arith.constant 0 : i32
    %c0_i32_0 = arith.constant 0 : i32
    return %arg0, %c0_i32 : i32, i32
  }
}

</mosaic_0001>

<bundles_post_ra>
// kernel: tpu_custom_call.1
= control target key start
LH: loop header
LB: loop body
LE: loop exit
PB: predicated region body
PF: predicated region fallthrough
CT: control target
= control target key end

     0   :  { %8 = vsyncpa [#allocation3], 0  ;;  %s559_s0 = inlined_call_operand.hbm [shape: f32[8,128], index: 0, kind: input, shape index: {}]   ;;  %s560_s1 = inlined_call_operand.hbm [shape: f32[8,128], index: 1, kind: input, shape index: {}]   ;;  %s561_s2 = inlined_call_operand.hbm [shape: f32[8,128], index: 2, kind: input, shape index: {}]   ;;  %s562_s3 = inlined_call_operand.hbm [shape: f32[8,128], index: 3, kind: output, shape index: {}]  }
   0x1   :  { %9 = vsyncpa [#allocation6], 0 }
   0x2   :  { %10 = vsyncpa [#allocation4], 0  ;;  %s391_s12 = smov [#allocation5]   ;;  %s392_s14 = smov [#allocation2]  }
   0x3   :  { %s27_s13 = sshll.u32 %s391_s12, 4  ;;  %s17_s15 = sshll.u32 %s392_s14, 4  ;;  %s28_s13 = int_to_ptr.vmem [resolvable:$true] %s27_s13  ;;  %s18_s15 = int_to_ptr.vmem [resolvable:$true] %s17_s15 }
   0x4   :  { %s297_s18 = scalar_lea.hbm %s560_s1, 128 }
   0x5   :  { %p298_p0 = scmp.ne.s32.totalorder %s560_s1, %s297_s18  ;;  %p301_p1 = scmp.lt.u32.totalorder %s297_s18, %s560_s1 }
   0x7   :  { %p303_p2 = pnand %p301_p1, %p298_p0 }
   0x9   :  { %306 = shalt.err (!%p303_p2)
}
   0xa   :  { %s307_s23 = scalar_lea.vmem %s28_s13, 128  ;;  %p312_p4 = scmp.lt.s32.totalorder %s28_s13, %s28_s13 }
   0xb   :  { %p308_p3 = scmp.ne.s32.totalorder %s28_s13, %s307_s23  ;;  %p313_p5 = scmp.lt.s32.totalorder %s307_s23, %s307_s23 }
   0xd   :  { %p314_p6 = por %p313_p5, %p312_p4 }
   0xf   :  { %p315_p7 = pnand %p314_p6, %p308_p3 }
  0x11   :  { %318 = shalt.err (!%p315_p7)
}
  0x12   :  { %30 = dma.hbm_to_vmem [thread:$0]  %s560_s1, 128, %s28_s13, [#allocation6]  }
  0x13   :  { %s319_s28 = scalar_lea.hbm %s559_s0, 128 }
  0x14   :  { %p320_p8 = scmp.ne.s32.totalorder %s559_s0, %s319_s28  ;;  %p323_p9 = scmp.lt.u32.totalorder %s319_s28, %s559_s0 }
  0x16   :  { %p325_p10 = pnand %p323_p9, %p320_p8 }
  0x18   :  { %328 = shalt.err (!%p325_p10)
}
  0x19   :  { %s329_s6 = scalar_lea.vmem %s18_s15, 128  ;;  %p334_p12 = scmp.lt.s32.totalorder %s18_s15, %s18_s15 }
  0x1a   :  { %p330_p11 = scmp.ne.s32.totalorder %s18_s15, %s329_s6  ;;  %p335_p13 = scmp.lt.s32.totalorder %s329_s6, %s329_s6 }
  0x1c   :  { %p336_p0 = por %p335_p13, %p334_p12 }
  0x1e   :  { %p337_p1 = pnand %p336_p0, %p330_p11 }
  0x20   :  { %340 = shalt.err (!%p337_p1)
}
  0x21   :  { %20 = dma.hbm_to_vmem [thread:$0]  %s559_s0, 128, %s18_s15, [#allocation3]  }
  0x22   :  { %s393_s8 = smov [#allocation7]   ;;  %s341_s12 = scalar_lea.hbm %s561_s2, 128 }
  0x23   :  { %s37_s9 = sshll.u32 %s393_s8, 4  ;;  %p342_p2 = scmp.ne.s32.totalorder %s561_s2, %s341_s12  ;;  %s38_s9 = int_to_ptr.vmem [resolvable:$true] %s37_s9 }
  0x24   :  { %p345_p3 = scmp.lt.u32.totalorder %s341_s12, %s561_s2 }
  0x26   :  { %p347_p4 = pnand %p345_p3, %p342_p2 }
  0x28   :  { %350 = shalt.err (!%p347_p4)
}
  0x29   :  { %s351_s18 = scalar_lea.vmem %s38_s9, 128  ;;  %p356_p6 = scmp.lt.s32.totalorder %s38_s9, %s38_s9 }
  0x2a   :  { %p352_p5 = scmp.ne.s32.totalorder %s38_s9, %s351_s18  ;;  %p357_p7 = scmp.lt.s32.totalorder %s351_s18, %s351_s18 }
  0x2c   :  { %p358_p8 = por %p357_p7, %p356_p6 }
  0x2e   :  { %p359_p9 = pnand %p358_p8, %p352_p5 }
  0x30   :  { %362 = shalt.err (!%p359_p9)
}
  0x31   :  { %40 = dma.hbm_to_vmem [thread:$0]  %s561_s2, 128, %s38_s9, [#allocation6]  }
  0x32   :  { %385 = dma.done.wait [#allocation3], 128  }
  0x33   :  { %386 = vsyncadd [#allocation3], 4294967168 }
  0x34   :  { %387 = dma.done.wait [#allocation6], 256  }
  0x35   :  { %388 = vsyncadd [#allocation6], 4294967040  ;;  %v51_v0 = vld [vmem:[#allocation5] sm:$0xff]  ;;  %v52_v1 = vld [vmem:[#allocation7] sm:$0xff]  ;;  %s394_s2 = smov [#allocation8]  }
  0x36   :  { %v451_v2 = vadd.f32 -1.0, %v51_v0  ;;  %v453_v3 = vadd.f32 -1.0, %v52_v1  ;;  %v168_v38 = vadd.f32 %v52_v1, %v51_v0  ;;  %s256_s19 = sshll.u32 %s394_s2, 4  ;;  %s257_s19 = int_to_ptr.vmem [resolvable:$true] %s256_s19 }
  0x37   :  { %s363_s20 = scalar_lea.vmem %s257_s19, 128  ;;  %p368_p11 = scmp.lt.s32.totalorder %s257_s19, %s257_s19 }
  0x38   :  { %v54_v4 = vadd.f32 1.0, %v451_v2  ;;  %v55_v5 = vadd.f32 2.0, %v451_v2  ;;  %v56_v6 = vadd.f32 3.0, %v451_v2  ;;  %v59_v7 = vadd.f32 6.0, %v451_v2  ;;  %p364_p10 = scmp.ne.s32.totalorder %s257_s19, %s363_s20  ;;  %p369_p12 = scmp.lt.s32.totalorder %s363_s20, %s363_s20 }
  0x39   :  { %v460_v8 = vadd.f32 7.0, %v451_v2  ;;  %v463_v9 = vadd.f32 8.0, %v451_v2  ;;  %v57_v10 = vadd.f32 4.0, %v451_v2  ;;  %v111_v12 = vadd.f32 1.0, %v453_v3 }
  0x3a   :  { %v62_v11 = vmul.f32 %v55_v5, %v54_v4  ;;  %v112_v13 = vadd.f32 2.0, %v453_v3  ;;  %v58_v14 = vadd.f32 5.0, %v451_v2  ;;  %v113_v16 = vadd.f32 3.0, %v453_v3  ;;  %p370_p13 = por %p369_p12, %p368_p11 }
  0x3b   :  { %v69_v15 = vmul.f32 %v463_v9, %v460_v8  ;;  %v114_v18 = vadd.f32 4.0, %v453_v3  ;;  %v474_v19 = vadd.f32 7.0, %v453_v3  ;;  %v116_v21 = vadd.f32 6.0, %v453_v3 }
  0x3c   :  { %v63_v17 = vmul.f32 %v62_v11, %v56_v6  ;;  %v478_v22 = vadd.f32 8.0, %v453_v3  ;;  %v119_v23 = vmul.f32 %v112_v13, %v111_v12  ;;  %v115_v29 = vadd.f32 5.0, %v453_v3  ;;  %p371_p0 = pnand %p370_p13, %p364_p10 }
  0x3d   :  { %v70_v20 = vmul.f32 %v69_v15, %v59_v7  ;;  %v494_v53 = vadd.f32 -1.0, %v168_v38  ;;  %vm227_vm1 = vcmp.eq.f32.partialorder %v451_v2, 0.0  ;;  %vm232_vm2 = vcmp.eq.f32.partialorder %v453_v3, 0.0 }
  0x3e   :  { %v64_v24 = vmul.f32 %v63_v17, %v57_v10  ;;  %v120_v26 = vmul.f32 %v119_v23, %v113_v16  ;;  %v126_v27 = vmul.f32 %v478_v22, %v474_v19 }
  0x3f   :  { %v71_v25 = vmul.f32 %v70_v20, %v58_v14  ;;  %v170_v1 = vadd.f32 1.0, %v494_v53 }
  0x40   :  { %v65_v28 = vmul.f32 %v64_v24, %v58_v14  ;;  %v121_v31 = vmul.f32 %v120_v26, %v114_v18  ;;  %v127_v32 = vmul.f32 %v126_v27, %v116_v21  ;;  %v86_v52 = vmul.f32 %v70_v20, %v64_v24 }
  0x41   :  { %v72_v30 = vmul.f32 %v71_v25, %v57_v10  ;;  %v83_v47 = vmul.f32 %v71_v25, %v63_v17  ;;  %v172_v14 = vadd.f32 3.0, %v494_v53  ;;  %v175_v17 = vadd.f32 6.0, %v494_v53 }
  0x42   :  { %v66_v33 = vmul.f32 %v65_v28, %v59_v7  ;;  %v122_v35 = vmul.f32 %v121_v31, %v115_v29  ;;  %v128_v37 = vmul.f32 %v127_v32, %v115_v29  ;;  %v87_v0 = vmul.f32 12.507343, %v86_v52 }
  0x43   :  { %v73_v34 = vmul.f32 %v72_v30, %v56_v6  ;;  %v80_v41 = vmul.f32 %v72_v30, %v62_v11  ;;  %v84_v59 = vmul.f32 -176.61504, %v83_v47  ;;  %v143_v10 = vmul.f32 %v127_v32, %v121_v31 }
  0x44   :  { %v484_v36 = vmul.f32 %v66_v33, %v460_v8  ;;  %v123_v42 = vmul.f32 %v122_v35, %v116_v21  ;;  %v129_v44 = vmul.f32 %v128_v37, %v114_v18  ;;  %v140_v60 = vmul.f32 %v128_v37, %v120_v26 }
  0x45   :  { %v74_v39 = vmul.f32 %v73_v34, %v55_v5  ;;  %v77_v40 = vmul.f32 %v73_v34, %v54_v4  ;;  %v81_v51 = vmul.f32 771.3234, %v80_v41  ;;  %v171_v4 = vadd.f32 2.0, %v494_v53 }
  0x46   :  { %v488_v43 = vmul.f32 %v484_v36, %v463_v9  ;;  %v491_v48 = vmul.f32 %v123_v42, %v474_v19  ;;  %v130_v49 = vmul.f32 %v129_v44, %v113_v16  ;;  %v137_v57 = vmul.f32 %v129_v44, %v119_v23  ;;  %v50_v44 = vld [vmem:[#allocation2] sm:$0xff] }
  0x47   :  { %v75_v45 = vmul.f32 676.5204, %v74_v39  ;;  %v78_v46 = vmul.f32 -1259.1392, %v77_v40  ;;  %v89_v5 = vmul.f32 %v69_v15, %v65_v28  ;;  %v176_v18 = vadd.f32 7.0, %v494_v53 }
  0x48   :  { %v498_v54 = vmul.f32 %v491_v48, %v478_v22  ;;  %v131_v55 = vmul.f32 %v130_v49, %v112_v13  ;;  %v134_v56 = vmul.f32 %v130_v49, %v111_v12  ;;  %v138_v7 = vmul.f32 771.3234, %v137_v57 }
  0x49   :  { %v76_v50 = vadd.f32 %v75_v45, %v488_v43  ;;  %v141_v13 = vmul.f32 -176.61504, %v140_v60  ;;  %v146_v12 = vmul.f32 %v126_v27, %v122_v35  ;;  %v507_v20 = vadd.f32 8.0, %v494_v53 }
  0x4a   :  { %v132_v61 = vmul.f32 676.5204, %v131_v55  ;;  %v135_v62 = vmul.f32 -1259.1392, %v134_v56  ;;  %v173_v21 = vadd.f32 4.0, %v494_v53  ;;  %v178_v15 = vmul.f32 %v171_v4, %v170_v1 }
  0x4b   :  { %v79_v58 = vadd.f32 %v78_v46, %v76_v50  ;;  %v144_v24 = vmul.f32 12.507343, %v143_v10  ;;  %v174_v25 = vadd.f32 5.0, %v494_v53  ;;  %v185_v26 = vmul.f32 %v507_v20, %v176_v18 }
  0x4c   :  { %v133_v6 = vadd.f32 %v132_v61, %v498_v54  ;;  %v90_v28 = vmul.f32 -0.1385711, %v89_v5  ;;  %v92_v29 = vmul.f32 %v66_v33, %v463_v9  ;;  %v179_v30 = vmul.f32 %v178_v15, %v172_v14 }
  0x4d   :  { %v82_v63 = vadd.f32 %v81_v51, %v79_v58  ;;  %v147_v32 = vmul.f32 -0.1385711, %v146_v12  ;;  %v149_v34 = vmul.f32 %v123_v42, %v478_v22  ;;  %v186_v35 = vmul.f32 %v185_v26, %v175_v17 }
  0x4e   :  { %v136_v16 = vadd.f32 %v135_v62, %v133_v6  ;;  %v515_v37 = vadd.f32 0.5, %v460_v8  ;;  %v180_v38 = vmul.f32 %v179_v30, %v173_v21  ;;  %v518_v40 = vadd.f32 0.5, %v474_v19 }
  0x4f   :  { %v85_v11 = vadd.f32 %v84_v59, %v82_v63  ;;  %v187_v41 = vmul.f32 %v186_v35, %v174_v25  ;;  %v93_v46 = vmul.f32 9.984369e-06, %v92_v29  ;;  %v150_v33 = vmul.f32 9.984369e-06, %v149_v34 }
  0x50   :  { %v139_v23 = vadd.f32 %v138_v7, %v136_v16  ;;  %v181_v47 = vmul.f32 %v180_v38, %v174_v25  ;;  %273 = vlog2.f32 %v515_v37  ;;  %v522_v42 = vsub.f32 0.0, %v50_v44 }
  0x51   :  { %v88_v27 = vadd.f32 %v87_v0, %v85_v11  ;;  %v188_v49 = vmul.f32 %v187_v41, %v173_v21  ;;  %275 = vlog2.f32 %v518_v40  ;;  %v95_v19 = vmul.f32 1.5056327e-07, %v484_v36 }
  0x52   :  { %v142_v31 = vadd.f32 %v141_v13, %v139_v23  ;;  %v182_v22 = vmul.f32 %v181_v47, %v175_v17  ;;  %v152_v51 = vmul.f32 1.5056327e-07, %v491_v48  ;;  %277 = vlog2.f32 %v488_v43 }
  0x53   :  { %v91_v45 = vadd.f32 %v90_v28, %v88_v27  ;;  %v189_v8 = vmul.f32 %v188_v49, %v172_v14  ;;  %v196_v58 = vmul.f32 %v188_v49, %v178_v15  ;;  %v528_v60 = vadd.f32 0.5, %v176_v18 }
  0x54   :  { %v145_v39 = vadd.f32 %v144_v24, %v142_v31  ;;  %v183_v52 = vmul.f32 %v182_v22, %v176_v18  ;;  %v199_v63 = vmul.f32 %v187_v41, %v179_v30  ;;  %v234_v0 = vadd.f32 1.0, %v522_v42 }
  0x55   :  { %v94_v50 = vadd.f32 %v93_v46, %v91_v45  ;;  %v190_v56 = vmul.f32 %v189_v8, %v171_v4  ;;  %v193_v57 = vmul.f32 %v189_v8, %v170_v1  ;;  %279 = vlog2.f32 %v498_v54 }
  0x56   :  { %v148_v9 = vadd.f32 %v147_v32, %v145_v39  ;;  %v184_v59 = vmul.f32 %v183_v52, %v507_v20  ;;  %v197_v6 = vmul.f32 771.3234, %v196_v58  ;;  %v202_v4 = vmul.f32 %v186_v35, %v180_v38 }
  0x57   :  { %v191_v61 = vmul.f32 676.5204, %v190_v56  ;;  %v194_v62 = vmul.f32 -1259.1392, %v193_v57  ;;  %v96_v5 = vadd.f32 %v95_v19, %v94_v50  ;;  %281 = vlog2.f32 %v528_v60 }
  0x58   :  { %v151_v55 = vadd.f32 %v150_v33, %v148_v9  ;;  %v200_v43 = vmul.f32 -176.61504, %v199_v63  ;;  %v205_v7 = vmul.f32 %v185_v26, %v181_v47  ;;  %283 = vlog2.f32 %v234_v0 }
  0x59   :  { %v192_v48 = vadd.f32 %v191_v61, %v184_v59  ;;  %285 = vlog2.f32 %v96_v5  ;;  %v203_v12 = vmul.f32 12.507343, %v202_v4  ;;  %v208_v14 = vmul.f32 %v182_v22, %v507_v20 }
  0x5a   :  { %v153_v36 = vadd.f32 %v152_v51, %v151_v55  ;;  %v274_v10 = vpop.eup %273  ;;  %v206_v54 = vmul.f32 -0.1385711, %v205_v7  ;;  %v98_v18 = vadd.f32 0.5, %v451_v2  ;;  %v155_v15 = vadd.f32 0.5, %v453_v3 }
  0x5b   :  { %v195_v1 = vadd.f32 %v194_v62, %v192_v48  ;;  %v276_v11 = vpop.eup %275  ;;  %v100_v21 = vmul.f32 0.6931472, %v274_v10  ;;  %v209_v25 = vmul.f32 9.984369e-06, %v208_v14  ;;  %v237_v27 = vmul.f32 -0.5, %v522_v42 }
  0x5c   :  { %287 = vlog2.f32 %v153_v36  ;;  %v278_v17 = vpop.eup %277  ;;  %v157_v23 = vmul.f32 0.6931472, %v276_v11  ;;  %v211_v29 = vmul.f32 1.5056327e-07, %v183_v52  ;;  %v214_v46 = vadd.f32 0.5, %v494_v53 }
  0x5d   :  { %v198_v13 = vadd.f32 %v197_v6, %v195_v1  ;;  %289 = vlog2.f32 %v50_v44  ;;  %v101_v31 = vmul.f32 %v100_v21, %v98_v18  ;;  %v238_v38 = vadd.f32 1.0, %v237_v27 }
  0x5e   :  { %v158_v32 = vmul.f32 %v157_v23, %v155_v15  ;;  %291 = vlog2.f32 %v184_v59  ;;  %v240_v44 = vand.u32 2147483647, %v522_v42  ;;  %v107_v9 = vmul.f32 0.6931472, %v278_v17 }
  0x5f   :  { %v201_v16 = vadd.f32 %v200_v43, %v198_v13  ;;  %v280_v26 = vpop.eup %279  ;;  %v102_v45 = vadd.f32 0.9189385, %v101_v31  ;;  %v239_v51 = vmul.f32 %v238_v38, %v522_v42 }
  0x60   :  { %v159_v33 = vadd.f32 0.9189385, %v158_v32  ;;  %v164_v49 = vmul.f32 0.6931472, %v280_v26  ;;  %vm241_vm0 = vcmp.lt.f32.partialorder %v240_v44, 0.0004427343 }
  0x61   :  { %v204_v24 = vadd.f32 %v203_v12, %v201_v16  ;;  %v282_v30 = vpop.eup %281  ;;  %v103_v55 = vsub.f32 %v102_v45, %v515_v37 }
  0x62   :  { %v284_v20 = vpop.eup %283  ;;  %v216_v47 = vmul.f32 0.6931472, %v282_v30  ;;  %v160_v58 = vsub.f32 %v159_v33, %v518_v40 }
  0x63   :  { %v207_v28 = vadd.f32 %v206_v54, %v204_v24  ;;  %v286_v35 = vpop.eup %285  ;;  %v236_v19 = vmul.f32 0.6931472, %v284_v20 }
  0x64   :  { %v105_v8 = vmul.f32 0.6931472, %v286_v35  ;;  %v217_v52 = vmul.f32 %v216_v47, %v214_v46 }
  0x65   :  { %v210_v34 = vadd.f32 %v209_v25, %v207_v28  ;;  %v242_v59 = vsel %vm241_vm0, %v239_v51, %v236_v19 }
  0x66   :  { %v288_v39 = vpop.eup %287  ;;  %v108_v57 = vsub.f32 %v105_v8, %v107_v9  ;;  %v218_v62 = vadd.f32 0.9189385, %v217_v52  ;;  %v243_v0 = vmul.f32 %v453_v3, %v242_v59 }
  0x67   :  { %v212_v41 = vadd.f32 %v211_v29, %v210_v34  ;;  %v290_v22 = vpop.eup %289  ;;  %v162_v50 = vmul.f32 0.6931472, %v288_v39 }
  0x68   :  { %v229_v56 = vmul.f32 0.6931472, %v290_v22  ;;  %v292_v61 = vpop.eup %291  ;;  %v109_v5 = vadd.f32 %v108_v57, %v103_v55  ;;  %v219_v48 = vsub.f32 %v218_v62, %v528_v60  ;;  %v244_v4 = vsel %vm232_vm2, 0.0, %v243_v0 }
  0x69   :  { %293 = vlog2.f32 %v212_v41  ;;  %v165_v53 = vsub.f32 %v162_v50, %v164_v49  ;;  %v223_v36 = vmul.f32 0.6931472, %v292_v61 }
  0x6a   :  { %v230_v63 = vmul.f32 %v451_v2, %v229_v56 }
  0x6b   :  { %v166_v42 = vadd.f32 %v165_v53, %v160_v58 }
  0x6c   :  { %v231_v40 = vsel %vm227_vm1, 0.0, %v230_v63 }
  0x6d   :  { %v167_v1 = vadd.f32 %v166_v42, %v109_v5  ;;  %v245_v10 = vadd.f32 %v244_v4, %v231_v40 }
  0x73   :  { %v294_v37 = vpop.eup %293 }
  0x74   :  { %v221_v6 = vmul.f32 0.6931472, %v294_v37 }
  0x76   :  { %v224_v43 = vsub.f32 %v221_v6, %v223_v36 }
  0x78   :  { %v225_v7 = vadd.f32 %v224_v43, %v219_v48 }
  0x7a   :  { %v226_v11 = vsub.f32 %v167_v1, %v225_v7 }
  0x7c   :  { %v246_v13 = vsub.f32 %v245_v10, %v226_v11 }
  0x7e   :  { %v247_v2 = vmul.f32 1.442695, %v246_v13 }
  0x80   :  { %295 = vpow2.f32 %v247_v2 }
  0x8a   :  { %v296_v12 = vpop.eup %295 }
  0x8b   :  { %249 = vst [vmem:[#allocation8] sm:$0xff] %v296_v12 }
  0x8c   :  { %374 = shalt.err (!%p371_p0)
}
  0x8d   :  { %s375_s23 = scalar_lea.hbm %s562_s3, 128 }
  0x8e   :  { %p376_p1 = scmp.ne.s32.totalorder %s562_s3, %s375_s23  ;;  %p379_p2 = scmp.lt.u32.totalorder %s375_s23, %s562_s3 }
  0x90   :  { %p381_p3 = pnand %p379_p2, %p376_p1 }
  0x92   :  { %384 = shalt.err (!%p381_p3)
}
  0x93   :  { %259 = dma.vmem_to_hbm [thread:$0]  %s257_s19, 128, %s562_s3, [#allocation4]  }
  0x94   :  { %389 = dma.done.wait [#allocation4], 128  }
  0x95   :  { %390 = vsyncadd [#allocation4], 4294967168 }
  0x96   :  { %263 = vsyncpa [#allocation3], 1 }
  0x97   :  { %264 = vsyncpa [#allocation6], 1 }
  0x98   :  { %265 = vsyncpa [#allocation4], 1 }

</bundles_post_ra>
